<compile_context>
chip_gen: v6e
topology: v6e:2x2x1
jax: 0.10.0
libtpu: 0.0.40
codegen_flags: <defaults>
</compile_context>

<pallas_src>
import functools

import numpy as np

import jax
import jax.numpy as jnp
from jax.experimental import pallas as pl
from jax.experimental.pallas import tpu as pltpu


# --------------------------------------------------------------------------------------
# Kernel
# --------------------------------------------------------------------------------------
def _decoder_mask_kernel(qi_ref, ki_ref, iki_ref, scores_ref, out_ref, *, tq, tk):
    """One scheduled tile: either a pure -inf fill (fully masked) or a masked copy."""
    t = pl.program_id(1)
    qi = qi_ref[t]          # query-block index (SMEM scalar prefetch)
    ki = ki_ref[t]          # key-block index
    del iki_ref             # only used by the input index_map
    row0 = qi * tq
    col0 = ki * tk

    # Strict upper triangle (diagonal=1): element masked iff col > row.
    fully_masked = col0 > row0 + (tq - 1)

    @pl.when(fully_masked)
    def _():
        # Input block is never read here; its fetch was elided via the clamped index_map.
        out_ref[...] = jnp.full(out_ref.shape, -jnp.inf, dtype=out_ref.dtype)

    @pl.when(jnp.logical_not(fully_masked))
    def _():
        s = scores_ref[...]                                   # (1, tq, tk)
        rows = jax.lax.broadcasted_iota(jnp.int32, s.shape, 1)
        cols = jax.lax.broadcasted_iota(jnp.int32, s.shape, 2)
        masked = (cols - rows) > (row0 - col0)                # col0+c > row0+r
        out_ref[...] = jnp.where(masked, jnp.asarray(-jnp.inf, dtype=s.dtype), s)


# --------------------------------------------------------------------------------------
# Tiling helpers
# --------------------------------------------------------------------------------------
def _sublane_align(itemsize):
    # Sub-32-bit dtypes pack along sublanes: 8 for f32, 16 for bf16, 32 for int8/fp8.
    return {4: 8, 2: 16, 1: 32}.get(itemsize, 8)


def _pick_tile(dim, target, align):
    """Largest multiple of `align` <= target that evenly divides `dim`; else the full dim."""
    if dim % align == 0 and dim >= align:
        t = min(target, dim)
        t -= t % align
        while t >= align:
            if dim % t == 0:
                return t
            t -= align
    return dim


def _vmem_capacity_bytes():
    try:
        return int(pltpu.get_tpu_info().vmem_capacity_bytes)
    except Exception:
        return 64 * 1024 * 1024   # conservative (v7x per-TensorCore VMEM)


def _build_schedule(S, tq, tk):
    """Flat list of (qi, ki, clamped input ki) for tiles containing >=1 masked element.

    Per qi-row, tiles are emitted with ascending ki so the clamped input index stays
    constant over the fully-masked tail -> Pallas elides those HBM fetches.
    """
    n_q, n_k = S // tq, S // tk
    qs, ks, iks = [], [], []
    n_reads = 0
    for qi in range(n_q):
        row_lo = qi * tq
        row_hi = row_lo + tq - 1
        last_needed = row_hi // tk            # last key block with any unmasked element
        prev_in = -1
        for ki in range(n_k):
            col_hi = (ki + 1) * tk - 1
            if col_hi <= row_lo:              # fully unmasked tile -> skip entirely
                continue
            in_ki = min(ki, last_needed)      # fully-masked tiles reuse the last band block
            qs.append(qi)
            ks.append(ki)
            iks.append(in_ki)
            if in_ki != prev_in:
                n_reads += 1
                prev_in = in_ki
    return (np.asarray(qs, np.int32), np.asarray(ks, np.int32),
            np.asarray(iks, np.int32), n_reads)


# --------------------------------------------------------------------------------------
# Wrapper (jitted; donates the scores buffer to make the in-place update real end-to-end)
# --------------------------------------------------------------------------------------
@functools.partial(jax.jit, static_argnums=(1,), static_argnames=("tq", "tk"),
                   donate_argnums=(0,))
def decoder_mask(attention_scores, seq_len, *, tq=None, tk=None):
    """Apply the causal decoder mask (triu, diagonal=1 -> -inf) to [B, H, S, S] scores."""
    B, H, S, S2 = attention_scores.shape
    assert S == S2 == seq_len, "scores must already be sliced to seq_len x seq_len"
    dtype = attention_scores.dtype
    if not jnp.issubdtype(dtype, jnp.floating):
        raise TypeError("decoder_mask requires a floating-point score dtype (uses -inf fill)")
    itemsize = jnp.dtype(dtype).itemsize

    # Collapse batch/head into one parallel axis (amortizes per-step overhead, shards
    # evenly across v7x's two TensorCores for typical B*H).
    BH = B * H
    x = attention_scores.reshape(BH, S, S)

    cap = _vmem_capacity_bytes()
    # Target block size: ~cap/16 (4 MiB on v7x's 64 MiB VMEM, 8 MiB on v5e/v6e's 128 MiB).
    block_budget = min(cap // 16, 8 << 20)

    if tk is None:
        tk = _pick_tile(S, min(1024, S), 128)                 # lane-dense when possible
    if tq is None:
        sub = _sublane_align(itemsize)
        tq_target = max(sub, min(block_budget // (tk * itemsize), 1024))
        tq = _pick_tile(S, min(tq_target, S), sub)
    if S % tq != 0 or S % tk != 0:
        raise ValueError(f"tq={tq}, tk={tk} must evenly divide seq_len={S}")

    block_bytes = tq * tk * itemsize
    # Guard the full-dim fallback: 2 in + 2 out buffers + Mosaic scratch must fit VMEM.
    ceiling = max(cap - (16 << 20), cap // 2) // 4
    if block_bytes > ceiling:
        # TODO(synk): support non-divisible / awkward seq_len via a cdiv grid with
        # bounds-masked edge tiles instead of full-dimension fallback blocks.
        raise ValueError(
            f"decoder_mask: block ({tq}x{tk}) needs {block_bytes} bytes of VMEM per buffer, "
            f"exceeding the per-buffer ceiling {ceiling}; pass explicit tq/tk dividing "
            f"seq_len={S}.")

    qs, ks, iks, n_reads_per_bh = _build_schedule(S, tq, tk)
    T = int(qs.shape[0])
    if T == 0:
        # seq_len <= 1: nothing strictly above the diagonal -> identity.
        return attention_scores

    qi_tbl = jnp.asarray(qs)
    ki_tbl = jnp.asarray(ks)
    iki_tbl = jnp.asarray(iks)

    def in_index(bh, t, qt_ref, kt_ref, ikt_ref):
        # Clamped key-block index: constant over the fully-masked tail of each row,
        # so Pallas skips those HBM->VMEM fetches (the kernel never reads them).
        return (bh, qt_ref[t], ikt_ref[t])

    def out_index(bh, t, qt_ref, kt_ref, ikt_ref):
        return (bh, qt_ref[t], kt_ref[t])

    kernel = functools.partial(_decoder_mask_kernel, tq=tq, tk=tk)

    vmem_limit = int(min(max(6 * block_bytes, 16 << 20), max(cap - (8 << 20), 16 << 20)))

    bytes_read = BH * n_reads_per_bh * block_bytes
    bytes_written = BH * T * block_bytes
    cost = pl.CostEstimate(flops=BH * T * tq * tk, transcendentals=0,
                           bytes_accessed=bytes_read + bytes_written)

    out = pl.pallas_call(
        kernel,
        out_shape=jax.ShapeDtypeStruct((BH, S, S), dtype),
        grid_spec=pltpu.PrefetchScalarGridSpec(
            num_scalar_prefetch=3,
            grid=(BH, T),                       # T innermost + "arbitrary": keeps the
            in_specs=[pl.BlockSpec((1, tq, tk), in_index)],   # fetch-elision intact
            out_specs=pl.BlockSpec((1, tq, tk), out_index),
        ),
        # Inputs are (qi_tbl, ki_tbl, iki_tbl, x) -> x is flat input index 3.
        input_output_aliases={3: 0},            # in-place, matching masked_fill_
        compiler_params=pltpu.CompilerParams(
            dimension_semantics=("parallel", "arbitrary"),
            vmem_limit_bytes=vmem_limit,
        ),
        cost_estimate=cost,
    )(qi_tbl, ki_tbl, iki_tbl, x)
    return out.reshape(B, H, S, S)


# --------------------------------------------------------------------------------------
# Reference & test
# --------------------------------------------------------------------------------------
def _reference(scores):
    S = scores.shape[-1]
    m = jnp.triu(jnp.ones((S, S), dtype=bool), k=1)
    return jnp.where(m[None, None, :, :], -jnp.inf, scores)


def _check(out, ref):
    same = (out == ref) | (jnp.isneginf(out) & jnp.isneginf(ref))
    assert bool(jnp.all(same)), "mismatch vs reference"


if __name__ == "__main__":
    key = jax.random.PRNGKey(0)

    # Shapes consistent with the module's forward: scores are [batch, heads, seq, seq].
    batch, heads, seq_len = 2, 4, 8
    k1, k2 = jax.random.split(key)
    scores = jax.random.normal(k1, (batch, heads, seq_len, seq_len), dtype=jnp.float32)
    ref = _reference(scores)                    # computed BEFORE the call (buffer is donated)
    out = jax.block_until_ready(decoder_mask(scores, seq_len))
    _check(out, ref)

    # Multi-tile path: exercises skipped lower-triangle tiles, the fully-masked -inf
    # branch (with elided input fetch), and the mixed diagonal branch.
    b2, h2, s2 = 1, 2, 256
    scores2 = jax.random.normal(k2, (b2, h2, s2, s2), dtype=jnp.float32)
    ref2 = _reference(scores2)
    out2 = jax.block_until_ready(decoder_mask(scores2, s2, tq=64, tk=128))
    _check(out2, ref2)

    print("KERNEL_OK")
</pallas_src>

<mosaic_0001>
module attributes {stable_mosaic.version = 11 : i64} {
  func.func @_decoder_mask_kernel(%arg0: i32, %arg1: i32, %arg2: memref<1xi32, #tpu.memory_space<smem>>, %arg3: memref<1xi32, #tpu.memory_space<smem>>, %arg4: memref<1xi32, #tpu.memory_space<smem>>, %arg5: memref<1x8x8xf32, #tpu.memory_space<vmem>>, %arg6: memref<1x8x8xf32, #tpu.memory_space<vmem>>) attributes {dimension_semantics = [#tpu.dimension_semantics<parallel>, #tpu.dimension_semantics<arbitrary>], iteration_bounds = array<i64: 8, 1>, scalar_prefetch = 3 : i64, scratch_operands = 0 : i64, tpu.core_type = #tpu.core_type<tc>, window_params = [{transform_indices = @transform_0, window_bounds = array<i64: 1, 8, 8>}, {transform_indices = @transform_1, window_bounds = array<i64: 1, 8, 8>}]} {
    %0 = arith.index_cast %arg1 : i32 to index
    %1 = memref.load %arg2[%0] : memref<1xi32, #tpu.memory_space<smem>>
    %2 = arith.index_cast %arg1 : i32 to index
    %3 = memref.load %arg3[%2] : memref<1xi32, #tpu.memory_space<smem>>
    %c8_i32 = arith.constant 8 : i32
    %4 = arith.muli %1, %c8_i32 : i32
    %c8_i32_0 = arith.constant 8 : i32
    %5 = arith.muli %3, %c8_i32_0 : i32
    %c7_i32 = arith.constant 7 : i32
    %6 = arith.addi %4, %c7_i32 : i32
    %7 = arith.cmpi sgt, %5, %6 : i32
    %8 = arith.extui %7 : i1 to i32
    %c0_i32 = arith.constant 0 : i32
    %9 = arith.cmpi ne, %8, %c0_i32 : i32
    scf.if %9 {
      %cst = arith.constant 0xFF800000 : f32
      %13 = vector.broadcast %cst : f32 to vector<1x8x8xf32>
      %c0 = arith.constant 0 : index
      %c0_2 = arith.constant 0 : index
      %c0_3 = arith.constant 0 : index
      %14 = vector.load %arg6[%c0, %c0_2, %c0_3] : memref<1x8x8xf32, #tpu.memory_space<vmem>>, vector<1x8x8xf32>
      tpu.vector_store %arg6[%c0, %c0_2, %c0_3], %13 {strides = array<i32>} : memref<1x8x8xf32, #tpu.memory_space<vmem>>, vector<1x8x8xf32>,
    } else {
    }
    %true = arith.constant true
    %10 = arith.xori %7, %true : i1
    %11 = arith.extui %10 : i1 to i32
    %c0_i32_1 = arith.constant 0 : i32
    %12 = arith.cmpi ne, %11, %c0_i32_1 : i32
    scf.if %12 {
      %c0 = arith.constant 0 : index
      %c0_2 = arith.constant 0 : index
      %c0_3 = arith.constant 0 : index
      %13 = vector.load %arg5[%c0, %c0_2, %c0_3] : memref<1x8x8xf32, #tpu.memory_space<vmem>>, vector<1x8x8xf32>
      %14 = tpu.iota {dimensions = array<i32: 1>} : vector<1x8x8xi32>
      %15 = tpu.iota {dimensions = array<i32: 2>} : vector<1x8x8xi32>
      %16 = arith.subi %15, %14 : vector<1x8x8xi32>
      %17 = arith.subi %4, %5 : i32
      %18 = vector.broadcast %17 : i32 to vector<1x8x8xi32>
      %19 = arith.cmpi sgt, %16, %18 : vector<1x8x8xi32>
      %cst = arith.constant 0xFF800000 : f32
      %20 = vector.broadcast %cst : f32 to vector<1x8x8xf32>
      %21 = arith.select %19, %20, %13 : vector<1x8x8xi1>, vector<1x8x8xf32>
      %c0_4 = arith.constant 0 : index
      %c0_5 = arith.constant 0 : index
      %c0_6 = arith.constant 0 : index
      %22 = vector.load %arg6[%c0_4, %c0_5, %c0_6] : memref<1x8x8xf32, #tpu.memory_space<vmem>>, vector<1x8x8xf32>
      tpu.vector_store %arg6[%c0_4, %c0_5, %c0_6], %21 {strides = array<i32>} : memref<1x8x8xf32, #tpu.memory_space<vmem>>, vector<1x8x8xf32>,
    } else {
    }
    return
  }
  func.func @transform_0(%arg0: i32, %arg1: i32, %arg2: memref<1xi32, #tpu.memory_space<smem>>, %arg3: memref<1xi32, #tpu.memory_space<smem>>, %arg4: memref<1xi32, #tpu.memory_space<smem>>) -> (i32, i32, i32) {
    %0 = arith.index_cast %arg1 : i32 to index
    %1 = memref.load %arg2[%0] : memref<1xi32, #tpu.memory_space<smem>>
    %2 = arith.index_cast %arg1 : i32 to index
    %3 = memref.load %arg4[%2] : memref<1xi32, #tpu.memory_space<smem>>
    %c0_i32 = arith.constant 0 : i32
    return %arg0, %1, %3 : i32, i32, i32
  }
  func.func @transform_1(%arg0: i32, %arg1: i32, %arg2: memref<1xi32, #tpu.memory_space<smem>>, %arg3: memref<1xi32, #tpu.memory_space<smem>>, %arg4: memref<1xi32, #tpu.memory_space<smem>>) -> (i32, i32, i32) {
    %0 = arith.index_cast %arg1 : i32 to index
    %1 = memref.load %arg2[%0] : memref<1xi32, #tpu.memory_space<smem>>
    %2 = arith.index_cast %arg1 : i32 to index
    %3 = memref.load %arg3[%2] : memref<1xi32, #tpu.memory_space<smem>>
    %c0_i32 = arith.constant 0 : i32
    return %arg0, %1, %3 : i32, i32, i32
  }
}

</mosaic_0001>

<bundles_post_ra>
// kernel: decoder_mask.1
= control target key start
LH: loop header
LB: loop body
LE: loop exit
PB: predicated region body
PF: predicated region fallthrough
CT: control target
= control target key end

     0   :  { %s755_s0 = inlined_call_operand.<no memory space> [shape: s32[1], index: 0, kind: input, shape index: {}, may-alias: {0,1,2}]   ;;  %s756_s1 = inlined_call_operand.<no memory space> [shape: s32[1], index: 1, kind: input, shape index: {}, may-alias: {0,1,2}]   ;;  %s757_s2 = inlined_call_operand.<no memory space> [shape: s32[1], index: 2, kind: input, shape index: {}, may-alias: {0,1,2}]   ;;  %s758_s3 = inlined_call_operand.hbm [shape: f32[8,8,8], index: 3, kind: input, shape index: {}, may-alias: {3,4}]   ;;  %s759_s4 = inlined_call_operand.hbm [shape: f32[8,8,8], index: 4, kind: output, shape index: {}, may-alias: {3,4}]  }
   0x1   :  { %9 = sst [smem:[#allocation3]] %s755_s0 }
   0x2   :  { %10 = sst [smem:[#allocation4]] %s756_s1 }
   0x3   :  { %11 = sst [smem:[#allocation5]] %s757_s2 }
   0x4   :  { %12 = vsyncpa [#allocation7], 0 }
   0x5   :  { %14 = vsyncpa [#allocation7 + $0x1], 0 }
   0x6   :  { %15 = vsyncpa [#allocation8], 0 }
   0x7   :  { %17 = vsyncpa [#allocation8 + $0x1], 0  ;;  %s576_s21 = smov 0   ;;  %s578_s22 = smov 0  }
   0x8   :  { %s580_s23 = smov 0   ;;  %s582_s24 = smov 0  }
   0x9   :  { %s584_s0 = smov 0   ;;  %s586_s25 = smov 0  }
   0xa   :  { %s588_s1 = smov 0   ;;  %s590_s26 = smov 0  }
   0xb   :  { %s592_s2 = smov 0  }
   0xc LB: > { %s301_s27 = sadd.s32 4294967295, %s537_s2   ;;  %s302_s28 = sadd.s32 4294967294, %s537_s2   ;;  %s537_s2 = sphi %s592_s2, %s23_s2   ;;  %s533_s26 = sphi %s590_s26, %s779_s26   ;;  %s529_s1 = sphi %s588_s1, %s778_s1   ;;  %s525_s25 = sphi %s586_s25, %s777_s25   ;;  %s521_s0 = sphi %s584_s0, %s776_s0   ;;  %s517_s24 = sphi %s582_s24, %s775_s24   ;;  %s513_s23 = sphi %s580_s23, %s774_s23   ;;  %s509_s22 = sphi %s578_s22, %s773_s22   ;;  %s505_s21 = sphi %s576_s21, %s772_s21  }
   0xd   : > { %s35_s29 = sadd.s32 1, %s533_s26  ;;  %s39_s30 = sld [smem:[#allocation3]] }
   0xe   : > { %p37_p0 = scmp.ge.s32.totalorder %s35_s29, 8  ;;  %s40_s5 = sld [smem:[#allocation5]] }
   0xf   : > { %s50_s6 = sadd.s32 1, %s525_s25  ;;  %p57_p1 = scmp.ne.s32.totalorder %s525_s25, %s521_s0 }
  0x10   : > { %s781_s29 = smov (%p37_p0, %s35_s29), 0  ;;  %p58_p2 = scmp.eq.s32.totalorder %s537_s2, 0 }
  0x11   : > { %p63_p3 = scmp.ne.s32.totalorder %s521_s0, %s517_s24  ;;  %s43_s7 = ssub.s32 %s533_s26, %s781_s29 }
  0x12   : > { %p64_p4 = scmp.eq.s32.totalorder %s301_s27, 0  ;;  %p631_p5 = por %p58_p2, %p57_p1 }
  0x13   : > { %p48_p7 = scmp.eq.s32.totalorder %s43_s7, 0  ;;  %s84_s10 = sadd.s32 1, %s513_s23 }
  0x14   : > { %p635_p6 = por %p64_p4, %p63_p3  ;;  %p94_p8 = scmp.ne.s32.totalorder %s513_s23, %s509_s22 }
  0x15   : > { %s643_s11 = scalar_select %p48_p7, %s525_s25, %s50_s6  }
  0x16   : > { %s763_s9 = scalar_select %p635_p6, 1, 0 }
  0x17   : > { %p95_p9 = scmp.eq.s32.totalorder %s301_s27, 7  ;;  %p100_p10 = scmp.ne.s32.totalorder %s509_s22, %s505_s21 }
  0x18   : > { %p101_p11 = scmp.eq.s32.totalorder %s302_s28, 7  ;;  %p330_p13 = scmp.lt.s32.totalorder %s537_s2, 8 }
  0x19   : > { %p647_p12 = por %p95_p9, %p94_p8  ;;  %s121_s14 = sand.u32 1, %s525_s25  }
  0x1a   : > { %p652_p0 = por %p101_p11, %p100_p10  ;;  %s305_s15 = sshll.u32 %s121_s14, 3 }
  0x1b   : > { %s764_s12 = scalar_select %p647_p12, 1, 0 }
  0x1c   : > { %s765_s13 = scalar_select %p652_p0, 1, 0 }
  0x1d   : > { %s131_s16 = sadd.s32 %s40_s5, %s39_s30  ;;  %s125_s20 = scalar_lea.vmem [#allocation6], %s305_s15 }
  0x1e   : > { %s658_s17 = scalar_select %p48_p7, %s513_s23, %s84_s10  }
  0x1f   : > { %s132_s18 = sadd.s32 %s533_s26, %s131_s16  ;;  %s136_s24 = sshll.u32 %s125_s20, 4  ;;  %s666_s24 = int_to_ptr.vmem [resolvable:$true] %s136_s24 }
  0x20   : > { %s306_s19 = sshll.u32 %s132_s18, 7  ;;  %p670_p1 = pnand %p330_p13, %p631_p5 }
  0x21   : > { %s664_s6 = scalar_lea.hbm %s758_s3, %s306_s19  ;;  %s122_s30 = scalar_lea.sflag [#allocation7], %s121_s14 }
  0x22   : > { %s405_s5 = scalar_lea.hbm %s664_s6, 128  ;;  %p407_p7 = pneg %p670_p1 }
  0x23   : > { %p406_p4 = scmp.ne.s32.totalorder %s664_s6, %s405_s5  ;;  %s410_s16 = scalar_lea.hbm %s758_s3, 1024 }
  0x24   : > { %p411_p5 = scmp.lt.s32.totalorder %s664_s6, %s758_s3  ;;  %p412_p10 = scmp.lt.s32.totalorder %s410_s16, %s405_s5 }
  0x25   : > { %p408_p8 = pnand %p407_p7, %p406_p4 }
  0x26   : > { %p413_p11 = por %p412_p10, %p411_p5 }
  0x27   : > { %p409_p9 = pneg %p408_p8 }
  0x29   : > { %p414_p13 = pnand %p413_p11, %p409_p9 }
  0x2b   : > { %417 = shalt.err (!%p414_p13)
}
  0x2c   : > { %s418_s14 = scalar_lea.vmem %s666_s24, 128  ;;  %s539_s19 = smov [#allocation6]  }
  0x2d   : > { %p419_p2 = scmp.ne.s32.totalorder %s666_s24, %s418_s14  ;;  %s423_s20 = sshll.u32 %s539_s19, 4  ;;  %s424_s20 = int_to_ptr.vmem [resolvable:$false] %s423_s20 }
  0x2e   : > { %s425_s27 = scalar_lea.vmem %s424_s20, 256  ;;  %p426_p8 = scmp.lt.s32.totalorder %s666_s24, %s424_s20 }
  0x2f   : > { %p421_p3 = pnand %p419_p2, %p407_p7  ;;  %p427_p0 = scmp.lt.s32.totalorder %s425_s27, %s418_s14 }
  0x31   : > { %p422_p4 = pneg %p421_p3  ;;  %p428_p12 = por %p427_p0, %p426_p8 }
  0x33   : > { %p429_p6 = pnand %p428_p12, %p422_p4 }
  0x35   : > { %432 = shalt.err (!%p429_p6)
}
  0x36   : > { %325 = dma.hbm_to_vmem [thread:$0]  (!%p670_p1), %s664_s6, 128, %s666_s24, %s122_s30  }
  0x37   : > { %p767_p9 = scmp.lt.s32.totalorder %s537_s2, 9  ;;  %p768_p5 = scmp.ge.s32.totalorder %s537_s2, 1 }
  0x39   : > { %p142_p2 = pnand %p768_p5, %p767_p9 }
  0x3a   : > { %s147_s28 = sand.u32 (!%p142_p2), 1, %s521_s0   ;;  %p769_p0 = scmp.ne.s32.totalorder (!%p142_p2), %s763_s9, 0 }
  0x3b   : > { %145 = sbr.rel (%p142_p2) target bundleno = 122 (0x7a), region = 24  ;;  %s308_s5 = sshll.u32 (!%p142_p2), %s147_s28, 3 }
  0x3c   : > { %s148_s10 = scalar_lea.sflag (!%p142_p2), [#allocation7], %s147_s28  ;;  %s151_s15 = scalar_lea.vmem (!%p142_p2), [#allocation6], %s308_s5 }
  0x40   : > { %496 = dma.done.wait (%p769_p0), %s148_s10, 128  }
  0x41   : > { %498 = vsyncadd (%p769_p0), %s148_s10, 4294967168  ;;  %s167_s7 = sand.u32 1, %s509_s22   ;;  %s174_s16 = sld [smem:[#allocation3]] }
  0x42   : > { %s309_s24 = sshll.u32 %s167_s7, 3  ;;  %s175_s6 = sld [smem:[#allocation4]] }
  0x43   : > { %s169_s14 = scalar_lea.vmem [#allocation9], %s309_s24 }
  0x47   : > { %s310_s30 = sshll.u32 %s174_s16, 3 }
  0x48   : > { %s311_s18 = sshll.u32 %s175_s6, 3  ;;  %s178_s8 = sadd.s32 7, %s310_s30 }
  0x49   : > { %p312_p6 = scmp.le.s32.totalorder %s311_s18, %s178_s8 }
  0x4b   : > { %182 = sbr.rel (%p312_p6) target bundleno = 82 (0x52), region = 32 }
  0x50   : > { %vm183_vm0 = vcmask 64512   ;;  %v540_v0 = vmov -inf  }
  0x51   : > { %184 = vst.msk [vmem:[%s169_s14] sm:$0xff] %vm183_vm0, %v540_v0 }
  0x52 PF: > { %p313_p12 = scmp.gt.s32.totalorder %s311_s18, %s178_s8 }
  0x53   : > { %s195_s9 = ssub.s32 (!%p313_p12), %s310_s30, %s311_s18 }
  0x54   : > { %188 = sbr.rel (%p313_p12) target bundleno = 98 (0x62), region = 36 }
  0x59   : > { %v190_v1 = vlaneseq  ;;  %v196_v4 = vstv %s195_s9  ;;  %v189_v5 = vld [vmem:[%s151_s15] sm:$0xff]  ;;  %vm199_vm1 = vcmask 64512  }
  0x5b   : > { %v191_v2 = vshrl.u32 %v190_v1, 7  ;;  %v193_v3 = vand.u32 127, %v190_v1 }
  0x5d   : > { %v194_v6 = vsub.s32 %v193_v3, %v191_v2 }
  0x5f   : > { %vm197_vm2 = vcmp.gt.s32.totalorder %v194_v6, %v196_v4 }
  0x60   : > { %v198_v7 = vsel %vm197_vm2, -inf, %v189_v5 }
  0x61   : > { %200 = vst.msk [vmem:[%s169_s14] sm:$0xff] %vm199_vm1, %v198_v7 }
  0x62 PF: > { %s209_s19 = sld [smem:[#allocation3]]  ;;  %s219_s27 = sshll.u32 %s169_s14, 4  ;;  %s220_s27 = int_to_ptr.vmem [resolvable:$true] %s219_s27 }
  0x63   : > { %s210_s20 = sld [smem:[#allocation4]]  ;;  %s202_s6 = scalar_lea.sflag [#allocation8], %s167_s7 }
  0x64   : > { %s433_s30 = scalar_lea.vmem %s220_s27, 128  ;;  %p770_p3 = scmp.ne.s32.totalorder %s764_s12, 0 }
  0x65   : > { %p434_p1 = scmp.ne.s32.totalorder %s220_s27, %s433_s30  ;;  %s541_s18 = smov [#allocation9]  }
  0x66   : > { %s437_s8 = sshll.u32 %s541_s18, 4  ;;  %s438_s8 = int_to_ptr.vmem [resolvable:$false] %s437_s8 }
  0x67   : > { %p435_p7 = pnand %p434_p1, %p770_p3  ;;  %s439_s9 = scalar_lea.vmem %s438_s8, 256 }
  0x68   : > { %p440_p11 = scmp.lt.s32.totalorder %s220_s27, %s438_s8  ;;  %p441_p13 = scmp.lt.s32.totalorder %s439_s9, %s433_s30 }
  0x69   : > { %s214_s28 = sadd.s32 %s210_s20, %s209_s19  ;;  %p436_p10 = pneg %p435_p7 }
  0x6a   : > { %s215_s5 = sadd.s32 %s529_s1, %s214_s28  ;;  %p442_p4 = por %p441_p13, %p440_p11 }
  0x6b   : > { %s315_s10 = sshll.u32 %s215_s5, 7 }
  0x6c   : > { %s217_s15 = scalar_lea.hbm %s759_s4, %s315_s10  ;;  %p443_p8 = pnand %p442_p4, %p436_p10 }
  0x6e   : > { %446 = shalt.err (!%p443_p8)
}
  0x6f   : > { %s447_s1 = scalar_lea.hbm %s217_s15, 128  ;;  %s451_s19 = scalar_lea.hbm %s759_s4, 1024 }
  0x70   : > { %p448_p9 = scmp.ne.s32.totalorder %s217_s15, %s447_s1  ;;  %p452_p0 = scmp.lt.s32.totalorder %s217_s15, %s759_s4 }
  0x71   : > { %p453_p6 = scmp.lt.s32.totalorder %s451_s19, %s447_s1 }
  0x72   : > { %p449_p5 = pnand %p448_p9, %p770_p3 }
  0x73   : > { %p454_p12 = por %p453_p6, %p452_p0 }
  0x74   : > { %p450_p2 = pneg %p449_p5 }
  0x76   : > { %p455_p1 = pnand %p454_p12, %p450_p2 }
  0x78   : > { %458 = shalt.err (!%p455_p1)
}
  0x79   : > { %320 = dma.vmem_to_hbm [thread:$0]  (%p770_p3), %s220_s27, 128, %s217_s15, %s202_s6  }
  0x7a PF: > { %p331_p7 = scmp.ge.s32.totalorder %s537_s2, 2  ;;  %s231_s5 = sand.u32 1, %s505_s21  }
  0x7b   : > { %p771_p10 = scmp.ne.s32.totalorder %s765_s13, 0  ;;  %s232_s10 = scalar_lea.sflag [#allocation8], %s231_s5 }
  0x7d   : > { %p327_p11 = pnand %p331_p7, %p771_p10 }
  0x7f   : > { %p328_p13 = pneg %p327_p11 }
  0x81   : > { %500 = dma.done.wait (%p328_p13), %s232_s10, 128  }
  0x82   : > { %502 = vsyncadd (%p328_p13), %s232_s10, 4294967168  ;;  %s23_s2 = sadd.s32 1, %s537_s2   ;;  %s772_s21 = smov %s509_s22 }
  0x83   : > { %p20_p4 = scmp.ge.s32.totalorder %s23_s2, 10   ;;  %s773_s22 = smov %s513_s23 }
  0x84   : > { %s774_s23 = smov %s658_s17  ;;  %s775_s24 = smov %s521_s0 }
  0x85   : > { %s776_s0 = smov %s525_s25  ;;  %s777_s25 = smov %s643_s11 }
  0x86   : > { %s778_s1 = smov %s533_s26  ;;  %s779_s26 = smov %s781_s29 }
  0x87   :  { %22 = sbr.rel (!%p20_p4) target bundleno = 12 (0xc), region = 77 }
  0x8c   :  { %237 = vsyncpa [#allocation7], 1 }
  0x8d   :  { %239 = vsyncpa [#allocation7 + $0x1], 1 }
  0x8e   :  { %240 = vsyncpa [#allocation8], 1 }
  0x8f   :  { %242 = vsyncpa [#allocation8 + $0x1], 1 }

</bundles_post_ra>
